<compile_context>
chip_gen: v6e
topology: v6e:2x2x1
jax: 0.10.0
libtpu: 0.0.40
codegen_flags: <defaults>
</compile_context>

<pallas_src>
import functools

import jax
import jax.numpy as jnp
from jax.experimental import pallas as pl
from jax.experimental.pallas import tpu as pltpu


def _gather_kernel(c_ref, f_ref, o_ref, *, nc2):
    # c_ref : SMEM (nc2,) f32   flattened covariance, C[i, j] at index i*ncat + j
    # f_ref : (tile_r, 128) i32 flat index (x*ncat + y) per pair
    # o_ref : (tile_r, 128) f32 covariance[x, y] per pair
    flat = f_ref[...]
    # Unrolled select chain over the nc2 (~ncat^2, O(50)) covariance entries.
    # k == 0 is handled by the initial fill (valid flats are in [0, nc2)).
    acc = jnp.full(flat.shape, c_ref[0], dtype=jnp.float32)
    for k in range(1, nc2):
        acc = jnp.where(flat == k, c_ref[k], acc)
    o_ref[...] = acc


def index_kernel_single(x_idx, y_idx, sqrt_covar_factor, std, *, max_tile_rows=256):
    """Pallas forward of IndexKernelSingle: returns covariance[x_idx, y_idx]."""
    B = x_idx.shape[0]
    ncat, _rank = sqrt_covar_factor.shape
    nc2 = ncat * ncat

    # ---- batch-independent parameter prep (once, outside the gridded kernel) ----
    cf = (sqrt_covar_factor * sqrt_covar_factor).astype(jnp.float32)
    C = jnp.dot(cf, cf.T, preferred_element_type=jnp.float32)
    C = C + jnp.diag((std * std).astype(jnp.float32))          # (ncat, ncat)
    c_flat = C.reshape(-1)                                      # (nc2,) f32 -> SMEM

    # ---- fused flat index stream, (8,128)-aligned 2-D slab layout ----
    flat = x_idx.astype(jnp.int32) * ncat + y_idx.astype(jnp.int32)   # (B,)

    lanes = 128
    rows = pl.cdiv(B, lanes)
    rows8 = ((rows + 7) // 8) * 8                               # sublane multiple
    tile_r = min(max_tile_rows, rows8)                          # up to 256x128 pairs/step
    rows_pad = ((rows8 + tile_r - 1) // tile_r) * tile_r
    b_pad = rows_pad * lanes

    flat_p = jnp.zeros((b_pad,), jnp.int32).at[:B].set(flat).reshape(rows_pad, lanes)

    grid = (rows_pad // tile_r,)
    out = pl.pallas_call(
        functools.partial(_gather_kernel, nc2=nc2),
        out_shape=jax.ShapeDtypeStruct((rows_pad, lanes), jnp.float32),
        grid_spec=pltpu.PrefetchScalarGridSpec(
            num_scalar_prefetch=1,                              # c_flat -> SMEM
            grid=grid,
            in_specs=[
                pl.BlockSpec((tile_r, lanes), lambda i, c: (i, 0)),
            ],
            out_specs=pl.BlockSpec((tile_r, lanes), lambda i, c: (i, 0)),
        ),
        compiler_params=pltpu.CompilerParams(
            dimension_semantics=("parallel",),   # megacore-shard the batch axis
        ),
    )(c_flat, flat_p)
    return out.reshape(-1)[:B]


def reference(x_idx, y_idx, sqrt_covar_factor, std):
    cf = sqrt_covar_factor * sqrt_covar_factor
    C = cf @ cf.T + jnp.diag(std * std)
    return C[x_idx, y_idx]


if __name__ == "__main__":
    key = jax.random.PRNGKey(0)
    k_x, k_y, k_w, k_s = jax.random.split(key, 4)

    nb_category = 7
    rank = 3
    fraction_diagonal = 0.9
    B = 2000                       # number of (x, y) index pairs

    # --- parameter init mirroring the module __init__ (constant), plus a small
    #     deterministic perturbation so the gather test is non-trivial
    #     (the parameters are trainable, so arbitrary values are valid). ---
    w0 = ((1.0 - fraction_diagonal) / (rank ** 0.5)) ** 0.5
    sqrt_covar_factor = (
        w0 * jnp.ones((nb_category, rank), jnp.float32)
        + 0.05 * jax.random.normal(k_w, (nb_category, rank), dtype=jnp.float32)
    )
    std = (
        fraction_diagonal * jnp.ones((nb_category,), jnp.float32)
        + 0.05 * jax.random.normal(k_s, (nb_category,), dtype=jnp.float32)
    )

    # --- deterministic example index columns ---
    x_idx = jax.random.randint(k_x, (B,), 0, nb_category, dtype=jnp.int32)
    y_idx = jax.random.randint(k_y, (B,), 0, nb_category, dtype=jnp.int32)

    out = index_kernel_single(x_idx, y_idx, sqrt_covar_factor, std)
    out = jax.block_until_ready(out)

    ref = reference(x_idx, y_idx, sqrt_covar_factor, std)
    assert out.shape == (B,)
    assert jnp.allclose(out, ref, atol=1e-5, rtol=1e-5), (out[:8], ref[:8])

    print("KERNEL_OK")
</pallas_src>

<mosaic_0001>
module attributes {stable_mosaic.version = 11 : i64} {
  func.func @_gather_kernel(%arg0: i32, %arg1: memref<49xf32, #tpu.memory_space<smem>>, %arg2: memref<16x128xi32, #tpu.memory_space<vmem>>, %arg3: memref<16x128xf32, #tpu.memory_space<vmem>>) attributes {dimension_semantics = [#tpu.dimension_semantics<parallel>], iteration_bounds = array<i64: 1>, scalar_prefetch = 1 : i64, scratch_operands = 0 : i64, tpu.core_type = #tpu.core_type<tc>, window_params = [{transform_indices = @transform_0, window_bounds = array<i64: 16, 128>}, {transform_indices = @transform_1, window_bounds = array<i64: 16, 128>}]} {
    %c0 = arith.constant 0 : index
    %c0_0 = arith.constant 0 : index
    %0 = vector.load %arg2[%c0, %c0_0] : memref<16x128xi32, #tpu.memory_space<vmem>>, vector<16x128xi32>
    %c0_1 = arith.constant 0 : index
    %1 = memref.load %arg1[%c0_1] : memref<49xf32, #tpu.memory_space<smem>>
    %2 = vector.broadcast %1 : f32 to vector<16x128xf32>
    %c1_i32 = arith.constant 1 : i32
    %3 = vector.broadcast %c1_i32 : i32 to vector<16x128xi32>
    %4 = arith.cmpi eq, %0, %3 : vector<16x128xi32>
    %c1 = arith.constant 1 : index
    %5 = memref.load %arg1[%c1] : memref<49xf32, #tpu.memory_space<smem>>
    %6 = vector.broadcast %5 : f32 to vector<16x128xf32>
    %7 = arith.select %4, %6, %2 : vector<16x128xi1>, vector<16x128xf32>
    %c2_i32 = arith.constant 2 : i32
    %8 = vector.broadcast %c2_i32 : i32 to vector<16x128xi32>
    %9 = arith.cmpi eq, %0, %8 : vector<16x128xi32>
    %c2 = arith.constant 2 : index
    %10 = memref.load %arg1[%c2] : memref<49xf32, #tpu.memory_space<smem>>
    %11 = vector.broadcast %10 : f32 to vector<16x128xf32>
    %12 = arith.select %9, %11, %7 : vector<16x128xi1>, vector<16x128xf32>
    %c3_i32 = arith.constant 3 : i32
    %13 = vector.broadcast %c3_i32 : i32 to vector<16x128xi32>
    %14 = arith.cmpi eq, %0, %13 : vector<16x128xi32>
    %c3 = arith.constant 3 : index
    %15 = memref.load %arg1[%c3] : memref<49xf32, #tpu.memory_space<smem>>
    %16 = vector.broadcast %15 : f32 to vector<16x128xf32>
    %17 = arith.select %14, %16, %12 : vector<16x128xi1>, vector<16x128xf32>
    %c4_i32 = arith.constant 4 : i32
    %18 = vector.broadcast %c4_i32 : i32 to vector<16x128xi32>
    %19 = arith.cmpi eq, %0, %18 : vector<16x128xi32>
    %c4 = arith.constant 4 : index
    %20 = memref.load %arg1[%c4] : memref<49xf32, #tpu.memory_space<smem>>
    %21 = vector.broadcast %20 : f32 to vector<16x128xf32>
    %22 = arith.select %19, %21, %17 : vector<16x128xi1>, vector<16x128xf32>
    %c5_i32 = arith.constant 5 : i32
    %23 = vector.broadcast %c5_i32 : i32 to vector<16x128xi32>
    %24 = arith.cmpi eq, %0, %23 : vector<16x128xi32>
    %c5 = arith.constant 5 : index
    %25 = memref.load %arg1[%c5] : memref<49xf32, #tpu.memory_space<smem>>
    %26 = vector.broadcast %25 : f32 to vector<16x128xf32>
    %27 = arith.select %24, %26, %22 : vector<16x128xi1>, vector<16x128xf32>
    %c6_i32 = arith.constant 6 : i32
    %28 = vector.broadcast %c6_i32 : i32 to vector<16x128xi32>
    %29 = arith.cmpi eq, %0, %28 : vector<16x128xi32>
    %c6 = arith.constant 6 : index
    %30 = memref.load %arg1[%c6] : memref<49xf32, #tpu.memory_space<smem>>
    %31 = vector.broadcast %30 : f32 to vector<16x128xf32>
    %32 = arith.select %29, %31, %27 : vector<16x128xi1>, vector<16x128xf32>
    %c7_i32 = arith.constant 7 : i32
    %33 = vector.broadcast %c7_i32 : i32 to vector<16x128xi32>
    %34 = arith.cmpi eq, %0, %33 : vector<16x128xi32>
    %c7 = arith.constant 7 : index
    %35 = memref.load %arg1[%c7] : memref<49xf32, #tpu.memory_space<smem>>
    %36 = vector.broadcast %35 : f32 to vector<16x128xf32>
    %37 = arith.select %34, %36, %32 : vector<16x128xi1>, vector<16x128xf32>
    %c8_i32 = arith.constant 8 : i32
    %38 = vector.broadcast %c8_i32 : i32 to vector<16x128xi32>
    %39 = arith.cmpi eq, %0, %38 : vector<16x128xi32>
    %c8 = arith.constant 8 : index
    %40 = memref.load %arg1[%c8] : memref<49xf32, #tpu.memory_space<smem>>
    %41 = vector.broadcast %40 : f32 to vector<16x128xf32>
    %42 = arith.select %39, %41, %37 : vector<16x128xi1>, vector<16x128xf32>
    %c9_i32 = arith.constant 9 : i32
    %43 = vector.broadcast %c9_i32 : i32 to vector<16x128xi32>
    %44 = arith.cmpi eq, %0, %43 : vector<16x128xi32>
    %c9 = arith.constant 9 : index
    %45 = memref.load %arg1[%c9] : memref<49xf32, #tpu.memory_space<smem>>
    %46 = vector.broadcast %45 : f32 to vector<16x128xf32>
    %47 = arith.select %44, %46, %42 : vector<16x128xi1>, vector<16x128xf32>
    %c10_i32 = arith.constant 10 : i32
    %48 = vector.broadcast %c10_i32 : i32 to vector<16x128xi32>
    %49 = arith.cmpi eq, %0, %48 : vector<16x128xi32>
    %c10 = arith.constant 10 : index
    %50 = memref.load %arg1[%c10] : memref<49xf32, #tpu.memory_space<smem>>
    %51 = vector.broadcast %50 : f32 to vector<16x128xf32>
    %52 = arith.select %49, %51, %47 : vector<16x128xi1>, vector<16x128xf32>
    %c11_i32 = arith.constant 11 : i32
    %53 = vector.broadcast %c11_i32 : i32 to vector<16x128xi32>
    %54 = arith.cmpi eq, %0, %53 : vector<16x128xi32>
    %c11 = arith.constant 11 : index
    %55 = memref.load %arg1[%c11] : memref<49xf32, #tpu.memory_space<smem>>
    %56 = vector.broadcast %55 : f32 to vector<16x128xf32>
    %57 = arith.select %54, %56, %52 : vector<16x128xi1>, vector<16x128xf32>
    %c12_i32 = arith.constant 12 : i32
    %58 = vector.broadcast %c12_i32 : i32 to vector<16x128xi32>
    %59 = arith.cmpi eq, %0, %58 : vector<16x128xi32>
    %c12 = arith.constant 12 : index
    %60 = memref.load %arg1[%c12] : memref<49xf32, #tpu.memory_space<smem>>
    %61 = vector.broadcast %60 : f32 to vector<16x128xf32>
    %62 = arith.select %59, %61, %57 : vector<16x128xi1>, vector<16x128xf32>
    %c13_i32 = arith.constant 13 : i32
    %63 = vector.broadcast %c13_i32 : i32 to vector<16x128xi32>
    %64 = arith.cmpi eq, %0, %63 : vector<16x128xi32>
    %c13 = arith.constant 13 : index
    %65 = memref.load %arg1[%c13] : memref<49xf32, #tpu.memory_space<smem>>
    %66 = vector.broadcast %65 : f32 to vector<16x128xf32>
    %67 = arith.select %64, %66, %62 : vector<16x128xi1>, vector<16x128xf32>
    %c14_i32 = arith.constant 14 : i32
    %68 = vector.broadcast %c14_i32 : i32 to vector<16x128xi32>
    %69 = arith.cmpi eq, %0, %68 : vector<16x128xi32>
    %c14 = arith.constant 14 : index
    %70 = memref.load %arg1[%c14] : memref<49xf32, #tpu.memory_space<smem>>
    %71 = vector.broadcast %70 : f32 to vector<16x128xf32>
    %72 = arith.select %69, %71, %67 : vector<16x128xi1>, vector<16x128xf32>
    %c15_i32 = arith.constant 15 : i32
    %73 = vector.broadcast %c15_i32 : i32 to vector<16x128xi32>
    %74 = arith.cmpi eq, %0, %73 : vector<16x128xi32>
    %c15 = arith.constant 15 : index
    %75 = memref.load %arg1[%c15] : memref<49xf32, #tpu.memory_space<smem>>
    %76 = vector.broadcast %75 : f32 to vector<16x128xf32>
    %77 = arith.select %74, %76, %72 : vector<16x128xi1>, vector<16x128xf32>
    %c16_i32 = arith.constant 16 : i32
    %78 = vector.broadcast %c16_i32 : i32 to vector<16x128xi32>
    %79 = arith.cmpi eq, %0, %78 : vector<16x128xi32>
    %c16 = arith.constant 16 : index
    %80 = memref.load %arg1[%c16] : memref<49xf32, #tpu.memory_space<smem>>
    %81 = vector.broadcast %80 : f32 to vector<16x128xf32>
    %82 = arith.select %79, %81, %77 : vector<16x128xi1>, vector<16x128xf32>
    %c17_i32 = arith.constant 17 : i32
    %83 = vector.broadcast %c17_i32 : i32 to vector<16x128xi32>
    %84 = arith.cmpi eq, %0, %83 : vector<16x128xi32>
    %c17 = arith.constant 17 : index
    %85 = memref.load %arg1[%c17] : memref<49xf32, #tpu.memory_space<smem>>
    %86 = vector.broadcast %85 : f32 to vector<16x128xf32>
    %87 = arith.select %84, %86, %82 : vector<16x128xi1>, vector<16x128xf32>
    %c18_i32 = arith.constant 18 : i32
    %88 = vector.broadcast %c18_i32 : i32 to vector<16x128xi32>
    %89 = arith.cmpi eq, %0, %88 : vector<16x128xi32>
    %c18 = arith.constant 18 : index
    %90 = memref.load %arg1[%c18] : memref<49xf32, #tpu.memory_space<smem>>
    %91 = vector.broadcast %90 : f32 to vector<16x128xf32>
    %92 = arith.select %89, %91, %87 : vector<16x128xi1>, vector<16x128xf32>
    %c19_i32 = arith.constant 19 : i32
    %93 = vector.broadcast %c19_i32 : i32 to vector<16x128xi32>
    %94 = arith.cmpi eq, %0, %93 : vector<16x128xi32>
    %c19 = arith.constant 19 : index
    %95 = memref.load %arg1[%c19] : memref<49xf32, #tpu.memory_space<smem>>
    %96 = vector.broadcast %95 : f32 to vector<16x128xf32>
    %97 = arith.select %94, %96, %92 : vector<16x128xi1>, vector<16x128xf32>
    %c20_i32 = arith.constant 20 : i32
    %98 = vector.broadcast %c20_i32 : i32 to vector<16x128xi32>
    %99 = arith.cmpi eq, %0, %98 : vector<16x128xi32>
    %c20 = arith.constant 20 : index
    %100 = memref.load %arg1[%c20] : memref<49xf32, #tpu.memory_space<smem>>
    %101 = vector.broadcast %100 : f32 to vector<16x128xf32>
    %102 = arith.select %99, %101, %97 : vector<16x128xi1>, vector<16x128xf32>
    %c21_i32 = arith.constant 21 : i32
    %103 = vector.broadcast %c21_i32 : i32 to vector<16x128xi32>
    %104 = arith.cmpi eq, %0, %103 : vector<16x128xi32>
    %c21 = arith.constant 21 : index
    %105 = memref.load %arg1[%c21] : memref<49xf32, #tpu.memory_space<smem>>
    %106 = vector.broadcast %105 : f32 to vector<16x128xf32>
    %107 = arith.select %104, %106, %102 : vector<16x128xi1>, vector<16x128xf32>
    %c22_i32 = arith.constant 22 : i32
    %108 = vector.broadcast %c22_i32 : i32 to vector<16x128xi32>
    %109 = arith.cmpi eq, %0, %108 : vector<16x128xi32>
    %c22 = arith.constant 22 : index
    %110 = memref.load %arg1[%c22] : memref<49xf32, #tpu.memory_space<smem>>
    %111 = vector.broadcast %110 : f32 to vector<16x128xf32>
    %112 = arith.select %109, %111, %107 : vector<16x128xi1>, vector<16x128xf32>
    %c23_i32 = arith.constant 23 : i32
    %113 = vector.broadcast %c23_i32 : i32 to vector<16x128xi32>
    %114 = arith.cmpi eq, %0, %113 : vector<16x128xi32>
    %c23 = arith.constant 23 : index
    %115 = memref.load %arg1[%c23] : memref<49xf32, #tpu.memory_space<smem>>
    %116 = vector.broadcast %115 : f32 to vector<16x128xf32>
    %117 = arith.select %114, %116, %112 : vector<16x128xi1>, vector<16x128xf32>
    %c24_i32 = arith.constant 24 : i32
    %118 = vector.broadcast %c24_i32 : i32 to vector<16x128xi32>
    %119 = arith.cmpi eq, %0, %118 : vector<16x128xi32>
    %c24 = arith.constant 24 : index
    %120 = memref.load %arg1[%c24] : memref<49xf32, #tpu.memory_space<smem>>
    %121 = vector.broadcast %120 : f32 to vector<16x128xf32>
    %122 = arith.select %119, %121, %117 : vector<16x128xi1>, vector<16x128xf32>
    %c25_i32 = arith.constant 25 : i32
    %123 = vector.broadcast %c25_i32 : i32 to vector<16x128xi32>
    %124 = arith.cmpi eq, %0, %123 : vector<16x128xi32>
    %c25 = arith.constant 25 : index
    %125 = memref.load %arg1[%c25] : memref<49xf32, #tpu.memory_space<smem>>
    %126 = vector.broadcast %125 : f32 to vector<16x128xf32>
    %127 = arith.select %124, %126, %122 : vector<16x128xi1>, vector<16x128xf32>
    %c26_i32 = arith.constant 26 : i32
    %128 = vector.broadcast %c26_i32 : i32 to vector<16x128xi32>
    %129 = arith.cmpi eq, %0, %128 : vector<16x128xi32>
    %c26 = arith.constant 26 : index
    %130 = memref.load %arg1[%c26] : memref<49xf32, #tpu.memory_space<smem>>
    %131 = vector.broadcast %130 : f32 to vector<16x128xf32>
    %132 = arith.select %129, %131, %127 : vector<16x128xi1>, vector<16x128xf32>
    %c27_i32 = arith.constant 27 : i32
    %133 = vector.broadcast %c27_i32 : i32 to vector<16x128xi32>
    %134 = arith.cmpi eq, %0, %133 : vector<16x128xi32>
    %c27 = arith.constant 27 : index
    %135 = memref.load %arg1[%c27] : memref<49xf32, #tpu.memory_space<smem>>
    %136 = vector.broadcast %135 : f32 to vector<16x128xf32>
    %137 = arith.select %134, %136, %132 : vector<16x128xi1>, vector<16x128xf32>
    %c28_i32 = arith.constant 28 : i32
    %138 = vector.broadcast %c28_i32 : i32 to vector<16x128xi32>
    %139 = arith.cmpi eq, %0, %138 : vector<16x128xi32>
    %c28 = arith.constant 28 : index
    %140 = memref.load %arg1[%c28] : memref<49xf32, #tpu.memory_space<smem>>
    %141 = vector.broadcast %140 : f32 to vector<16x128xf32>
    %142 = arith.select %139, %141, %137 : vector<16x128xi1>, vector<16x128xf32>
    %c29_i32 = arith.constant 29 : i32
    %143 = vector.broadcast %c29_i32 : i32 to vector<16x128xi32>
    %144 = arith.cmpi eq, %0, %143 : vector<16x128xi32>
    %c29 = arith.constant 29 : index
    %145 = memref.load %arg1[%c29] : memref<49xf32, #tpu.memory_space<smem>>
    %146 = vector.broadcast %145 : f32 to vector<16x128xf32>
    %147 = arith.select %144, %146, %142 : vector<16x128xi1>, vector<16x128xf32>
    %c30_i32 = arith.constant 30 : i32
    %148 = vector.broadcast %c30_i32 : i32 to vector<16x128xi32>
    %149 = arith.cmpi eq, %0, %148 : vector<16x128xi32>
    %c30 = arith.constant 30 : index
    %150 = memref.load %arg1[%c30] : memref<49xf32, #tpu.memory_space<smem>>
    %151 = vector.broadcast %150 : f32 to vector<16x128xf32>
    %152 = arith.select %149, %151, %147 : vector<16x128xi1>, vector<16x128xf32>
    %c31_i32 = arith.constant 31 : i32
    %153 = vector.broadcast %c31_i32 : i32 to vector<16x128xi32>
    %154 = arith.cmpi eq, %0, %153 : vector<16x128xi32>
    %c31 = arith.constant 31 : index
    %155 = memref.load %arg1[%c31] : memref<49xf32, #tpu.memory_space<smem>>
    %156 = vector.broadcast %155 : f32 to vector<16x128xf32>
    %157 = arith.select %154, %156, %152 : vector<16x128xi1>, vector<16x128xf32>
    %c32_i32 = arith.constant 32 : i32
    %158 = vector.broadcast %c32_i32 : i32 to vector<16x128xi32>
    %159 = arith.cmpi eq, %0, %158 : vector<16x128xi32>
    %c32 = arith.constant 32 : index
    %160 = memref.load %arg1[%c32] : memref<49xf32, #tpu.memory_space<smem>>
    %161 = vector.broadcast %160 : f32 to vector<16x128xf32>
    %162 = arith.select %159, %161, %157 : vector<16x128xi1>, vector<16x128xf32>
    %c33_i32 = arith.constant 33 : i32
    %163 = vector.broadcast %c33_i32 : i32 to vector<16x128xi32>
    %164 = arith.cmpi eq, %0, %163 : vector<16x128xi32>
    %c33 = arith.constant 33 : index
    %165 = memref.load %arg1[%c33] : memref<49xf32, #tpu.memory_space<smem>>
    %166 = vector.broadcast %165 : f32 to vector<16x128xf32>
    %167 = arith.select %164, %166, %162 : vector<16x128xi1>, vector<16x128xf32>
    %c34_i32 = arith.constant 34 : i32
    %168 = vector.broadcast %c34_i32 : i32 to vector<16x128xi32>
    %169 = arith.cmpi eq, %0, %168 : vector<16x128xi32>
    %c34 = arith.constant 34 : index
    %170 = memref.load %arg1[%c34] : memref<49xf32, #tpu.memory_space<smem>>
    %171 = vector.broadcast %170 : f32 to vector<16x128xf32>
    %172 = arith.select %169, %171, %167 : vector<16x128xi1>, vector<16x128xf32>
    %c35_i32 = arith.constant 35 : i32
    %173 = vector.broadcast %c35_i32 : i32 to vector<16x128xi32>
    %174 = arith.cmpi eq, %0, %173 : vector<16x128xi32>
    %c35 = arith.constant 35 : index
    %175 = memref.load %arg1[%c35] : memref<49xf32, #tpu.memory_space<smem>>
    %176 = vector.broadcast %175 : f32 to vector<16x128xf32>
    %177 = arith.select %174, %176, %172 : vector<16x128xi1>, vector<16x128xf32>
    %c36_i32 = arith.constant 36 : i32
    %178 = vector.broadcast %c36_i32 : i32 to vector<16x128xi32>
    %179 = arith.cmpi eq, %0, %178 : vector<16x128xi32>
    %c36 = arith.constant 36 : index
    %180 = memref.load %arg1[%c36] : memref<49xf32, #tpu.memory_space<smem>>
    %181 = vector.broadcast %180 : f32 to vector<16x128xf32>
    %182 = arith.select %179, %181, %177 : vector<16x128xi1>, vector<16x128xf32>
    %c37_i32 = arith.constant 37 : i32
    %183 = vector.broadcast %c37_i32 : i32 to vector<16x128xi32>
    %184 = arith.cmpi eq, %0, %183 : vector<16x128xi32>
    %c37 = arith.constant 37 : index
    %185 = memref.load %arg1[%c37] : memref<49xf32, #tpu.memory_space<smem>>
    %186 = vector.broadcast %185 : f32 to vector<16x128xf32>
    %187 = arith.select %184, %186, %182 : vector<16x128xi1>, vector<16x128xf32>
    %c38_i32 = arith.constant 38 : i32
    %188 = vector.broadcast %c38_i32 : i32 to vector<16x128xi32>
    %189 = arith.cmpi eq, %0, %188 : vector<16x128xi32>
    %c38 = arith.constant 38 : index
    %190 = memref.load %arg1[%c38] : memref<49xf32, #tpu.memory_space<smem>>
    %191 = vector.broadcast %190 : f32 to vector<16x128xf32>
    %192 = arith.select %189, %191, %187 : vector<16x128xi1>, vector<16x128xf32>
    %c39_i32 = arith.constant 39 : i32
    %193 = vector.broadcast %c39_i32 : i32 to vector<16x128xi32>
    %194 = arith.cmpi eq, %0, %193 : vector<16x128xi32>
    %c39 = arith.constant 39 : index
    %195 = memref.load %arg1[%c39] : memref<49xf32, #tpu.memory_space<smem>>
    %196 = vector.broadcast %195 : f32 to vector<16x128xf32>
    %197 = arith.select %194, %196, %192 : vector<16x128xi1>, vector<16x128xf32>
    %c40_i32 = arith.constant 40 : i32
    %198 = vector.broadcast %c40_i32 : i32 to vector<16x128xi32>
    %199 = arith.cmpi eq, %0, %198 : vector<16x128xi32>
    %c40 = arith.constant 40 : index
    %200 = memref.load %arg1[%c40] : memref<49xf32, #tpu.memory_space<smem>>
    %201 = vector.broadcast %200 : f32 to vector<16x128xf32>
    %202 = arith.select %199, %201, %197 : vector<16x128xi1>, vector<16x128xf32>
    %c41_i32 = arith.constant 41 : i32
    %203 = vector.broadcast %c41_i32 : i32 to vector<16x128xi32>
    %204 = arith.cmpi eq, %0, %203 : vector<16x128xi32>
    %c41 = arith.constant 41 : index
    %205 = memref.load %arg1[%c41] : memref<49xf32, #tpu.memory_space<smem>>
    %206 = vector.broadcast %205 : f32 to vector<16x128xf32>
    %207 = arith.select %204, %206, %202 : vector<16x128xi1>, vector<16x128xf32>
    %c42_i32 = arith.constant 42 : i32
    %208 = vector.broadcast %c42_i32 : i32 to vector<16x128xi32>
    %209 = arith.cmpi eq, %0, %208 : vector<16x128xi32>
    %c42 = arith.constant 42 : index
    %210 = memref.load %arg1[%c42] : memref<49xf32, #tpu.memory_space<smem>>
    %211 = vector.broadcast %210 : f32 to vector<16x128xf32>
    %212 = arith.select %209, %211, %207 : vector<16x128xi1>, vector<16x128xf32>
    %c43_i32 = arith.constant 43 : i32
    %213 = vector.broadcast %c43_i32 : i32 to vector<16x128xi32>
    %214 = arith.cmpi eq, %0, %213 : vector<16x128xi32>
    %c43 = arith.constant 43 : index
    %215 = memref.load %arg1[%c43] : memref<49xf32, #tpu.memory_space<smem>>
    %216 = vector.broadcast %215 : f32 to vector<16x128xf32>
    %217 = arith.select %214, %216, %212 : vector<16x128xi1>, vector<16x128xf32>
    %c44_i32 = arith.constant 44 : i32
    %218 = vector.broadcast %c44_i32 : i32 to vector<16x128xi32>
    %219 = arith.cmpi eq, %0, %218 : vector<16x128xi32>
    %c44 = arith.constant 44 : index
    %220 = memref.load %arg1[%c44] : memref<49xf32, #tpu.memory_space<smem>>
    %221 = vector.broadcast %220 : f32 to vector<16x128xf32>
    %222 = arith.select %219, %221, %217 : vector<16x128xi1>, vector<16x128xf32>
    %c45_i32 = arith.constant 45 : i32
    %223 = vector.broadcast %c45_i32 : i32 to vector<16x128xi32>
    %224 = arith.cmpi eq, %0, %223 : vector<16x128xi32>
    %c45 = arith.constant 45 : index
    %225 = memref.load %arg1[%c45] : memref<49xf32, #tpu.memory_space<smem>>
    %226 = vector.broadcast %225 : f32 to vector<16x128xf32>
    %227 = arith.select %224, %226, %222 : vector<16x128xi1>, vector<16x128xf32>
    %c46_i32 = arith.constant 46 : i32
    %228 = vector.broadcast %c46_i32 : i32 to vector<16x128xi32>
    %229 = arith.cmpi eq, %0, %228 : vector<16x128xi32>
    %c46 = arith.constant 46 : index
    %230 = memref.load %arg1[%c46] : memref<49xf32, #tpu.memory_space<smem>>
    %231 = vector.broadcast %230 : f32 to vector<16x128xf32>
    %232 = arith.select %229, %231, %227 : vector<16x128xi1>, vector<16x128xf32>
    %c47_i32 = arith.constant 47 : i32
    %233 = vector.broadcast %c47_i32 : i32 to vector<16x128xi32>
    %234 = arith.cmpi eq, %0, %233 : vector<16x128xi32>
    %c47 = arith.constant 47 : index
    %235 = memref.load %arg1[%c47] : memref<49xf32, #tpu.memory_space<smem>>
    %236 = vector.broadcast %235 : f32 to vector<16x128xf32>
    %237 = arith.select %234, %236, %232 : vector<16x128xi1>, vector<16x128xf32>
    %c48_i32 = arith.constant 48 : i32
    %238 = vector.broadcast %c48_i32 : i32 to vector<16x128xi32>
    %239 = arith.cmpi eq, %0, %238 : vector<16x128xi32>
    %c48 = arith.constant 48 : index
    %240 = memref.load %arg1[%c48] : memref<49xf32, #tpu.memory_space<smem>>
    %241 = vector.broadcast %240 : f32 to vector<16x128xf32>
    %242 = arith.select %239, %241, %237 : vector<16x128xi1>, vector<16x128xf32>
    %c0_2 = arith.constant 0 : index
    %c0_3 = arith.constant 0 : index
    %243 = vector.load %arg3[%c0_2, %c0_3] : memref<16x128xf32, #tpu.memory_space<vmem>>, vector<16x128xf32>
    tpu.vector_store %arg3[%c0_2, %c0_3], %242 {strides = array<i32>} : memref<16x128xf32, #tpu.memory_space<vmem>>, vector<16x128xf32>,
    return
  }
  func.func @transform_0(%arg0: i32, %arg1: memref<49xf32, #tpu.memory_space<smem>>) -> (i32, i32) {
    %c0_i32 = arith.constant 0 : i32
    %c0_i32_0 = arith.constant 0 : i32
    return %arg0, %c0_i32 : i32, i32
  }
  func.func @transform_1(%arg0: i32, %arg1: memref<49xf32, #tpu.memory_space<smem>>) -> (i32, i32) {
    %c0_i32 = arith.constant 0 : i32
    %c0_i32_0 = arith.constant 0 : i32
    return %arg0, %c0_i32 : i32, i32
  }
}

</mosaic_0001>

<bundles_post_ra>
// kernel: tpu_custom_call.1
= control target key start
LH: loop header
LB: loop body
LE: loop exit
PB: predicated region body
PF: predicated region fallthrough
CT: control target
= control target key end

     0   :  { %s446_s9 = smov [#allocation3]   ;;  %s716_s0 = inlined_call_operand.hbm [shape: f32[49], index: 0, kind: input, shape index: {}]   ;;  %s717_s1 = inlined_call_operand.hbm [shape: s32[16,128], index: 1, kind: input, shape index: {}]   ;;  %s718_s2 = inlined_call_operand.hbm [shape: f32[16,128], index: 2, kind: output, shape index: {}]  }
   0x1   :  { %8 = dma.hbm_to_smem %s716_s0, 16, %s446_s9, [#allocation2] }
   0x2   :  { %440 = dma.done.wait [#allocation2], 16 }
   0x3   :  { %441 = vsyncadd [#allocation2], 4294967280 }
   0x4   :  { %10 = sfence }
   0x5   :  { %11 = vsyncpa [#allocation5], 0 }
   0x6   :  { %12 = vsyncpa [#allocation6], 0  ;;  %s447_s12 = smov [#allocation4]  }
   0x7   :  { %s18_s13 = sshll.u32 %s447_s12, 4  ;;  %s19_s13 = int_to_ptr.vmem [resolvable:$true] %s18_s13 }
   0x8   :  { %s408_s14 = scalar_lea.vmem %s19_s13, 256  ;;  %p413_p1 = scmp.lt.s32.totalorder %s19_s13, %s19_s13 }
   0x9   :  { %p409_p0 = scmp.ne.s32.totalorder %s19_s13, %s408_s14  ;;  %p414_p2 = scmp.lt.s32.totalorder %s408_s14, %s408_s14 }
   0xb   :  { %p415_p3 = por %p414_p2, %p413_p1 }
   0xd   :  { %p416_p4 = pnand %p415_p3, %p409_p0 }
   0xf   :  { %419 = shalt.err (!%p416_p4)
}
  0x10   :  { %s448_s15 = smov 128   ;;  %s449_s16 = smov 8  }
  0x11   :  { %24 = dma.hbm_to_vmem [thread:$0]  %s717_s1, 256, %s19_s13, [#allocation5], %s448_s15, %s448_s15, %s449_s16  }
  0x12   :  { %442 = dma.done.wait [#allocation5], 256  }
  0x13   :  { %443 = vsyncadd [#allocation5], 4294967040  ;;  %s30_s18 = sld [smem:[#allocation3]]  ;;  %v479_v0 = vld [vmem:[#allocation4] sm:$0xff]  ;;  %v481_v1 = vld [vmem:[#allocation4 + $0x8] sm:$0xff] }
  0x14   :  { %s339_s19 = sld [smem:[#allocation3 + $0x1]]  ;;  %vm32_vm0 = vcmp.eq.s32.totalorder %v479_v0, 1  ;;  %vm33_vm1 = vcmp.eq.s32.totalorder %v481_v1, 1  ;;  %vm38_vm2 = vcmp.eq.s32.totalorder %v479_v0, 2  ;;  %vm39_vm3 = vcmp.eq.s32.totalorder %v481_v1, 2 }
  0x15   :  { %s340_s20 = sld [smem:[#allocation3 + $0x2]]  ;;  %vm44_vm4 = vcmp.eq.s32.totalorder %v479_v0, 3  ;;  %vm45_vm5 = vcmp.eq.s32.totalorder %v481_v1, 3  ;;  %vm50_vm6 = vcmp.eq.s32.totalorder %v479_v0, 4  ;;  %vm51_vm7 = vcmp.eq.s32.totalorder %v481_v1, 4 }
  0x16   :  { %s341_s21 = sld [smem:[#allocation3 + $0x3]]  ;;  %vm56_vm8 = vcmp.eq.s32.totalorder %v479_v0, 5  ;;  %vm57_vm9 = vcmp.eq.s32.totalorder %v481_v1, 5  ;;  %vm62_vm10 = vcmp.eq.s32.totalorder %v479_v0, 6  ;;  %vm63_vm11 = vcmp.eq.s32.totalorder %v481_v1, 6 }
  0x17   :  { %s475_s22 = sld [smem:[#allocation3 + $0x4]]  ;;  %vm68_vm12 = vcmp.eq.s32.totalorder %v479_v0, 7  ;;  %vm69_vm13 = vcmp.eq.s32.totalorder %v481_v1, 7  ;;  %vm74_vm14 = vcmp.eq.s32.totalorder %v479_v0, 8  ;;  %vm75_vm15 = vcmp.eq.s32.totalorder %v481_v1, 8 }
  0x18   :  { %s477_s23 = sld [smem:[#allocation3 + $0x5]] }
  0x19   :  { %v31_v2 = vstv %s30_s18  ;;  %s483_s24 = sld [smem:[#allocation3 + $0x6]] }
  0x1a   :  { %v35_v3 = vstv %s339_s19  ;;  %s488_s1 = sld [smem:[#allocation3 + $0x7]] }
  0x1b   :  { %v36_v4 = vsel %vm32_vm0, %v35_v3, %v31_v2  ;;  %v37_v5 = vsel %vm33_vm1, %v35_v3, %v31_v2  ;;  %v41_v6 = vstv %s340_s20  ;;  %s491_s25 = sld [smem:[#allocation3 + $0x8]]  ;;  %vm80_vm0 = vcmp.eq.s32.totalorder %v479_v0, 9 }
  0x1c   :  { %v42_v7 = vsel %vm38_vm2, %v41_v6, %v36_v4  ;;  %v43_v8 = vsel %vm39_vm3, %v41_v6, %v37_v5  ;;  %s495_s26 = sld [smem:[#allocation3 + $0x9]]  ;;  %v47_v9 = vstv %s341_s21  ;;  %vm81_vm1 = vcmp.eq.s32.totalorder %v481_v1, 9 }
  0x1d   :  { %v53_v10 = vstv %s475_s22  ;;  %s500_s27 = sld [smem:[#allocation3 + $0xa]]  ;;  %v48_v11 = vsel %vm44_vm4, %v47_v9, %v42_v7  ;;  %v49_v12 = vsel %vm45_vm5, %v47_v9, %v43_v8  ;;  %vm86_vm2 = vcmp.eq.s32.totalorder %v479_v0, 10 }
  0x1e   :  { %s504_s28 = sld [smem:[#allocation3 + $0xb]]  ;;  %v54_v13 = vsel %vm50_vm6, %v53_v10, %v48_v11  ;;  %v55_v14 = vsel %vm51_vm7, %v53_v10, %v49_v12  ;;  %v59_v15 = vstv %s477_s23  ;;  %vm87_vm3 = vcmp.eq.s32.totalorder %v481_v1, 10 }
  0x1f   :  { %s508_s29 = sld [smem:[#allocation3 + $0xc]]  ;;  %v60_v16 = vsel %vm56_vm8, %v59_v15, %v54_v13  ;;  %v61_v17 = vsel %vm57_vm9, %v59_v15, %v55_v14  ;;  %v65_v18 = vstv %s483_s24  ;;  %vm92_vm4 = vcmp.eq.s32.totalorder %v479_v0, 11 }
  0x20   :  { %v66_v19 = vsel %vm62_vm10, %v65_v18, %v60_v16  ;;  %v67_v20 = vsel %vm63_vm11, %v65_v18, %v61_v17  ;;  %s514_s30 = sld [smem:[#allocation3 + $0xd]]  ;;  %v71_v21 = vstv %s488_s1  ;;  %vm93_vm5 = vcmp.eq.s32.totalorder %v481_v1, 11 }
  0x21   :  { %v77_v22 = vstv %s491_s25  ;;  %s520_s3 = sld [smem:[#allocation3 + $0xe]]  ;;  %v72_v23 = vsel %vm68_vm12, %v71_v21, %v66_v19  ;;  %v73_v24 = vsel %vm69_vm13, %v71_v21, %v67_v20  ;;  %vm98_vm6 = vcmp.eq.s32.totalorder %v479_v0, 12 }
  0x22   :  { %s524_s4 = sld [smem:[#allocation3 + $0xf]]  ;;  %v78_v25 = vsel %vm74_vm14, %v77_v22, %v72_v23  ;;  %v79_v26 = vsel %vm75_vm15, %v77_v22, %v73_v24  ;;  %v83_v27 = vstv %s495_s26  ;;  %vm99_vm7 = vcmp.eq.s32.totalorder %v481_v1, 12 }
  0x23   :  { %s528_s5 = sld [smem:[#allocation3 + $0x10]]  ;;  %v84_v28 = vsel %vm80_vm0, %v83_v27, %v78_v25  ;;  %v85_v29 = vsel %vm81_vm1, %v83_v27, %v79_v26  ;;  %v89_v30 = vstv %s500_s27  ;;  %vm104_vm8 = vcmp.eq.s32.totalorder %v479_v0, 13 }
  0x24   :  { %v90_v31 = vsel %vm86_vm2, %v89_v30, %v84_v28  ;;  %v91_v32 = vsel %vm87_vm3, %v89_v30, %v85_v29  ;;  %s534_s6 = sld [smem:[#allocation3 + $0x11]]  ;;  %v95_v33 = vstv %s504_s28  ;;  %vm105_vm9 = vcmp.eq.s32.totalorder %v481_v1, 13 }
  0x25   :  { %v101_v34 = vstv %s508_s29  ;;  %s540_s7 = sld [smem:[#allocation3 + $0x12]]  ;;  %v96_v35 = vsel %vm92_vm4, %v95_v33, %v90_v31  ;;  %v97_v36 = vsel %vm93_vm5, %v95_v33, %v91_v32  ;;  %vm110_vm10 = vcmp.eq.s32.totalorder %v479_v0, 14 }
  0x26   :  { %s544_s8 = sld [smem:[#allocation3 + $0x13]]  ;;  %v102_v37 = vsel %vm98_vm6, %v101_v34, %v96_v35  ;;  %v103_v38 = vsel %vm99_vm7, %v101_v34, %v97_v36  ;;  %v107_v39 = vstv %s514_s30  ;;  %vm111_vm11 = vcmp.eq.s32.totalorder %v481_v1, 14 }
  0x27   :  { %s548_s9 = sld [smem:[#allocation3 + $0x14]]  ;;  %v108_v40 = vsel %vm104_vm8, %v107_v39, %v102_v37  ;;  %v109_v41 = vsel %vm105_vm9, %v107_v39, %v103_v38  ;;  %v113_v42 = vstv %s520_s3  ;;  %vm116_vm12 = vcmp.eq.s32.totalorder %v479_v0, 15 }
  0x28   :  { %v114_v43 = vsel %vm110_vm10, %v113_v42, %v108_v40  ;;  %v115_v44 = vsel %vm111_vm11, %v113_v42, %v109_v41  ;;  %vm117_vm13 = vcmp.eq.s32.totalorder %v481_v1, 15  ;;  %s554_s10 = sld [smem:[#allocation3 + $0x15]]  ;;  %v119_v45 = vstv %s524_s4 }
  0x29   :  { %vm122_vm14 = vcmp.eq.s32.totalorder %v479_v0, 16  ;;  %vm123_vm15 = vcmp.eq.s32.totalorder %v481_v1, 16  ;;  %v125_v46 = vstv %s528_s5  ;;  %s560_s11 = sld [smem:[#allocation3 + $0x16]]  ;;  %v120_v47 = vsel %vm116_vm12, %v119_v45, %v114_v43 }
  0x2a   :  { %v121_v48 = vsel %vm117_vm13, %v119_v45, %v115_v44  ;;  %vm128_vm0 = vcmp.eq.s32.totalorder %v479_v0, 17  ;;  %vm129_vm1 = vcmp.eq.s32.totalorder %v481_v1, 17  ;;  %s564_s12 = sld [smem:[#allocation3 + $0x17]]  ;;  %v126_v49 = vsel %vm122_vm14, %v125_v46, %v120_v47 }
  0x2b   :  { %v127_v50 = vsel %vm123_vm15, %v125_v46, %v121_v48  ;;  %v131_v51 = vstv %s534_s6  ;;  %vm134_vm2 = vcmp.eq.s32.totalorder %v479_v0, 18  ;;  %s568_s13 = sld [smem:[#allocation3 + $0x18]]  ;;  %vm135_vm3 = vcmp.eq.s32.totalorder %v481_v1, 18 }
  0x2c   :  { %v132_v52 = vsel %vm128_vm0, %v131_v51, %v126_v49  ;;  %v133_v53 = vsel %vm129_vm1, %v131_v51, %v127_v50  ;;  %v137_v54 = vstv %s540_s7  ;;  %vm140_vm4 = vcmp.eq.s32.totalorder %v479_v0, 19  ;;  %s574_s14 = sld [smem:[#allocation3 + $0x19]] }
  0x2d   :  { %v138_v55 = vsel %vm134_vm2, %v137_v54, %v132_v52  ;;  %v139_v56 = vsel %vm135_vm3, %v137_v54, %v133_v53  ;;  %vm141_vm5 = vcmp.eq.s32.totalorder %v481_v1, 19  ;;  %v143_v57 = vstv %s544_s8  ;;  %s580_s0 = sld [smem:[#allocation3 + $0x1a]] }
  0x2e   :  { %vm146_vm6 = vcmp.eq.s32.totalorder %v479_v0, 20  ;;  %vm147_vm7 = vcmp.eq.s32.totalorder %v481_v1, 20  ;;  %v149_v58 = vstv %s548_s9  ;;  %v144_v59 = vsel %vm140_vm4, %v143_v57, %v138_v55  ;;  %s584_s17 = sld [smem:[#allocation3 + $0x1b]] }
  0x2f   :  { %v145_v60 = vsel %vm141_vm5, %v143_v57, %v139_v56  ;;  %vm152_vm8 = vcmp.eq.s32.totalorder %v479_v0, 21  ;;  %vm153_vm9 = vcmp.eq.s32.totalorder %v481_v1, 21  ;;  %v150_v61 = vsel %vm146_vm6, %v149_v58, %v144_v59  ;;  %s588_s18 = sld [smem:[#allocation3 + $0x1c]] }
  0x30   :  { %v151_v62 = vsel %vm147_vm7, %v149_v58, %v145_v60  ;;  %v155_v63 = vstv %s554_s10  ;;  %vm158_vm10 = vcmp.eq.s32.totalorder %v479_v0, 22  ;;  %vm159_vm11 = vcmp.eq.s32.totalorder %v481_v1, 22  ;;  %s594_s19 = sld [smem:[#allocation3 + $0x1d]]  ;;  %s450_s10 = smov [#allocation7]  }
  0x31   :  { %v156_v2 = vsel %vm152_vm8, %v155_v63, %v150_v61  ;;  %v157_v3 = vsel %vm153_vm9, %v155_v63, %v151_v62  ;;  %v161_v4 = vstv %s560_s11  ;;  %vm164_vm12 = vcmp.eq.s32.totalorder %v479_v0, 23  ;;  %s600_s20 = sld [smem:[#allocation3 + $0x1e]]  ;;  %s327_s11 = sshll.u32 %s450_s10, 4  ;;  %s328_s11 = int_to_ptr.vmem [resolvable:$true] %s327_s11 }
  0x32   :  { %v162_v5 = vsel %vm158_vm10, %v161_v4, %v156_v2  ;;  %v163_v6 = vsel %vm159_vm11, %v161_v4, %v157_v3  ;;  %vm165_vm13 = vcmp.eq.s32.totalorder %v481_v1, 23  ;;  %v167_v7 = vstv %s564_s12  ;;  %s604_s21 = sld [smem:[#allocation3 + $0x1f]]  ;;  %s420_s12 = scalar_lea.vmem %s328_s11, 256 }
  0x33   :  { %vm170_vm14 = vcmp.eq.s32.totalorder %v479_v0, 24  ;;  %vm171_vm15 = vcmp.eq.s32.totalorder %v481_v1, 24  ;;  %v173_v8 = vstv %s568_s13  ;;  %v168_v9 = vsel %vm164_vm12, %v167_v7, %v162_v5  ;;  %s608_s22 = sld [smem:[#allocation3 + $0x20]]  ;;  %p421_p5 = scmp.ne.s32.totalorder %s328_s11, %s420_s12 }
  0x34   :  { %v169_v10 = vsel %vm165_vm13, %v167_v7, %v163_v6  ;;  %vm176_vm0 = vcmp.eq.s32.totalorder %v479_v0, 25  ;;  %vm177_vm1 = vcmp.eq.s32.totalorder %v481_v1, 25  ;;  %v174_v11 = vsel %vm170_vm14, %v173_v8, %v168_v9  ;;  %s614_s23 = sld [smem:[#allocation3 + $0x21]]  ;;  %p425_p6 = scmp.lt.s32.totalorder %s328_s11, %s328_s11 }
  0x35   :  { %v175_v12 = vsel %vm171_vm15, %v173_v8, %v169_v10  ;;  %v179_v13 = vstv %s574_s14  ;;  %vm182_vm2 = vcmp.eq.s32.totalorder %v479_v0, 26  ;;  %vm183_vm3 = vcmp.eq.s32.totalorder %v481_v1, 26  ;;  %s620_s24 = sld [smem:[#allocation3 + $0x22]]  ;;  %p426_p7 = scmp.lt.s32.totalorder %s420_s12, %s420_s12 }
  0x36   :  { %v180_v14 = vsel %vm176_vm0, %v179_v13, %v174_v11  ;;  %v181_v15 = vsel %vm177_vm1, %v179_v13, %v175_v12  ;;  %v185_v16 = vstv %s580_s0  ;;  %vm188_vm4 = vcmp.eq.s32.totalorder %v479_v0, 27  ;;  %s624_s1 = sld [smem:[#allocation3 + $0x23]] }
  0x37   :  { %v186_v17 = vsel %vm182_vm2, %v185_v16, %v180_v14  ;;  %v187_v18 = vsel %vm183_vm3, %v185_v16, %v181_v15  ;;  %vm189_vm5 = vcmp.eq.s32.totalorder %v481_v1, 27  ;;  %v191_v19 = vstv %s584_s17  ;;  %s628_s25 = sld [smem:[#allocation3 + $0x24]]  ;;  %p427_p8 = por %p426_p7, %p425_p6 }
  0x38   :  { %vm194_vm6 = vcmp.eq.s32.totalorder %v479_v0, 28  ;;  %vm195_vm7 = vcmp.eq.s32.totalorder %v481_v1, 28  ;;  %v197_v20 = vstv %s588_s18  ;;  %v192_v21 = vsel %vm188_vm4, %v191_v19, %v186_v17  ;;  %s634_s26 = sld [smem:[#allocation3 + $0x25]] }
  0x39   :  { %v193_v22 = vsel %vm189_vm5, %v191_v19, %v187_v18  ;;  %vm200_vm8 = vcmp.eq.s32.totalorder %v479_v0, 29  ;;  %vm201_vm9 = vcmp.eq.s32.totalorder %v481_v1, 29  ;;  %v198_v23 = vsel %vm194_vm6, %v197_v20, %v192_v21  ;;  %s640_s27 = sld [smem:[#allocation3 + $0x26]]  ;;  %p428_p9 = pnand %p427_p8, %p421_p5 }
  0x3a   :  { %v199_v24 = vsel %vm195_vm7, %v197_v20, %v193_v22  ;;  %v203_v25 = vstv %s594_s19  ;;  %vm206_vm10 = vcmp.eq.s32.totalorder %v479_v0, 30  ;;  %vm207_vm11 = vcmp.eq.s32.totalorder %v481_v1, 30  ;;  %s644_s28 = sld [smem:[#allocation3 + $0x27]] }
  0x3b   :  { %v204_v26 = vsel %vm200_vm8, %v203_v25, %v198_v23  ;;  %v205_v27 = vsel %vm201_vm9, %v203_v25, %v199_v24  ;;  %v209_v28 = vstv %s600_s20  ;;  %vm212_vm12 = vcmp.eq.s32.totalorder %v479_v0, 31  ;;  %s648_s29 = sld [smem:[#allocation3 + $0x28]] }
  0x3c   :  { %v210_v29 = vsel %vm206_vm10, %v209_v28, %v204_v26  ;;  %v211_v30 = vsel %vm207_vm11, %v209_v28, %v205_v27  ;;  %vm213_vm13 = vcmp.eq.s32.totalorder %v481_v1, 31  ;;  %v215_v31 = vstv %s604_s21  ;;  %s654_s30 = sld [smem:[#allocation3 + $0x29]] }
  0x3d   :  { %vm218_vm14 = vcmp.eq.s32.totalorder %v479_v0, 32  ;;  %vm219_vm15 = vcmp.eq.s32.totalorder %v481_v1, 32  ;;  %v221_v32 = vstv %s608_s22  ;;  %v216_v33 = vsel %vm212_vm12, %v215_v31, %v210_v29  ;;  %s660_s3 = sld [smem:[#allocation3 + $0x2a]] }
  0x3e   :  { %v217_v34 = vsel %vm213_vm13, %v215_v31, %v211_v30  ;;  %vm224_vm0 = vcmp.eq.s32.totalorder %v479_v0, 33  ;;  %vm225_vm1 = vcmp.eq.s32.totalorder %v481_v1, 33  ;;  %v222_v35 = vsel %vm218_vm14, %v221_v32, %v216_v33  ;;  %s664_s4 = sld [smem:[#allocation3 + $0x2b]] }
  0x3f   :  { %v223_v36 = vsel %vm219_vm15, %v221_v32, %v217_v34  ;;  %v227_v37 = vstv %s614_s23  ;;  %vm230_vm2 = vcmp.eq.s32.totalorder %v479_v0, 34  ;;  %vm231_vm3 = vcmp.eq.s32.totalorder %v481_v1, 34  ;;  %s668_s5 = sld [smem:[#allocation3 + $0x2c]] }
  0x40   :  { %v228_v38 = vsel %vm224_vm0, %v227_v37, %v222_v35  ;;  %v229_v39 = vsel %vm225_vm1, %v227_v37, %v223_v36  ;;  %v233_v40 = vstv %s620_s24  ;;  %vm236_vm4 = vcmp.eq.s32.totalorder %v479_v0, 35  ;;  %s674_s6 = sld [smem:[#allocation3 + $0x2d]] }
  0x41   :  { %v234_v41 = vsel %vm230_vm2, %v233_v40, %v228_v38  ;;  %v235_v42 = vsel %vm231_vm3, %v233_v40, %v229_v39  ;;  %vm237_vm5 = vcmp.eq.s32.totalorder %v481_v1, 35  ;;  %v239_v43 = vstv %s624_s1  ;;  %s680_s7 = sld [smem:[#allocation3 + $0x2e]] }
  0x42   :  { %vm242_vm6 = vcmp.eq.s32.totalorder %v479_v0, 36  ;;  %vm243_vm7 = vcmp.eq.s32.totalorder %v481_v1, 36  ;;  %v245_v44 = vstv %s628_s25  ;;  %v240_v45 = vsel %vm236_vm4, %v239_v43, %v234_v41  ;;  %s684_s8 = sld [smem:[#allocation3 + $0x2f]] }
  0x43   :  { %v241_v46 = vsel %vm237_vm5, %v239_v43, %v235_v42  ;;  %vm248_vm8 = vcmp.eq.s32.totalorder %v479_v0, 37  ;;  %vm249_vm9 = vcmp.eq.s32.totalorder %v481_v1, 37  ;;  %v246_v47 = vsel %vm242_vm6, %v245_v44, %v240_v45  ;;  %s688_s9 = sld [smem:[#allocation3 + $0x30]] }
  0x44   :  { %v247_v48 = vsel %vm243_vm7, %v245_v44, %v241_v46  ;;  %v251_v49 = vstv %s634_s26  ;;  %vm254_vm10 = vcmp.eq.s32.totalorder %v479_v0, 38  ;;  %vm255_vm11 = vcmp.eq.s32.totalorder %v481_v1, 38 }
  0x45   :  { %v252_v50 = vsel %vm248_vm8, %v251_v49, %v246_v47  ;;  %v253_v51 = vsel %vm249_vm9, %v251_v49, %v247_v48  ;;  %v257_v52 = vstv %s640_s27  ;;  %vm260_vm12 = vcmp.eq.s32.totalorder %v479_v0, 39 }
  0x46   :  { %v258_v53 = vsel %vm254_vm10, %v257_v52, %v252_v50  ;;  %v259_v54 = vsel %vm255_vm11, %v257_v52, %v253_v51  ;;  %vm261_vm13 = vcmp.eq.s32.totalorder %v481_v1, 39  ;;  %v263_v55 = vstv %s644_s28 }
  0x47   :  { %vm266_vm14 = vcmp.eq.s32.totalorder %v479_v0, 40  ;;  %vm267_vm15 = vcmp.eq.s32.totalorder %v481_v1, 40  ;;  %v269_v56 = vstv %s648_s29  ;;  %v264_v57 = vsel %vm260_vm12, %v263_v55, %v258_v53 }
  0x48   :  { %v265_v58 = vsel %vm261_vm13, %v263_v55, %v259_v54  ;;  %vm272_vm0 = vcmp.eq.s32.totalorder %v479_v0, 41  ;;  %vm273_vm1 = vcmp.eq.s32.totalorder %v481_v1, 41  ;;  %v270_v59 = vsel %vm266_vm14, %v269_v56, %v264_v57 }
  0x49   :  { %v271_v60 = vsel %vm267_vm15, %v269_v56, %v265_v58  ;;  %v275_v61 = vstv %s654_s30  ;;  %vm278_vm2 = vcmp.eq.s32.totalorder %v479_v0, 42  ;;  %vm279_vm3 = vcmp.eq.s32.totalorder %v481_v1, 42 }
  0x4a   :  { %v276_v62 = vsel %vm272_vm0, %v275_v61, %v270_v59  ;;  %v277_v63 = vsel %vm273_vm1, %v275_v61, %v271_v60  ;;  %v281_v2 = vstv %s660_s3  ;;  %vm284_vm4 = vcmp.eq.s32.totalorder %v479_v0, 43 }
  0x4b   :  { %v282_v3 = vsel %vm278_vm2, %v281_v2, %v276_v62  ;;  %v283_v4 = vsel %vm279_vm3, %v281_v2, %v277_v63  ;;  %vm285_vm5 = vcmp.eq.s32.totalorder %v481_v1, 43  ;;  %v287_v5 = vstv %s664_s4 }
  0x4c   :  { %vm290_vm6 = vcmp.eq.s32.totalorder %v479_v0, 44  ;;  %vm291_vm7 = vcmp.eq.s32.totalorder %v481_v1, 44  ;;  %v293_v6 = vstv %s668_s5  ;;  %v288_v7 = vsel %vm284_vm4, %v287_v5, %v282_v3 }
  0x4d   :  { %v289_v8 = vsel %vm285_vm5, %v287_v5, %v283_v4  ;;  %vm296_vm8 = vcmp.eq.s32.totalorder %v479_v0, 45  ;;  %vm297_vm9 = vcmp.eq.s32.totalorder %v481_v1, 45  ;;  %v294_v9 = vsel %vm290_vm6, %v293_v6, %v288_v7 }
  0x4e   :  { %v295_v10 = vsel %vm291_vm7, %v293_v6, %v289_v8  ;;  %v299_v11 = vstv %s674_s6  ;;  %vm302_vm10 = vcmp.eq.s32.totalorder %v479_v0, 46  ;;  %vm303_vm11 = vcmp.eq.s32.totalorder %v481_v1, 46 }
  0x4f   :  { %v300_v12 = vsel %vm296_vm8, %v299_v11, %v294_v9  ;;  %v301_v13 = vsel %vm297_vm9, %v299_v11, %v295_v10  ;;  %v305_v14 = vstv %s680_s7  ;;  %vm308_vm12 = vcmp.eq.s32.totalorder %v479_v0, 47 }
  0x50   :  { %v306_v15 = vsel %vm302_vm10, %v305_v14, %v300_v12  ;;  %v307_v16 = vsel %vm303_vm11, %v305_v14, %v301_v13  ;;  %vm309_vm13 = vcmp.eq.s32.totalorder %v481_v1, 47  ;;  %v311_v17 = vstv %s684_s8 }
  0x51   :  { %vm314_vm14 = vcmp.eq.s32.totalorder %v479_v0, 48  ;;  %vm315_vm15 = vcmp.eq.s32.totalorder %v481_v1, 48  ;;  %v317_v18 = vstv %s688_s9  ;;  %v312_v19 = vsel %vm308_vm12, %v311_v17, %v306_v15 }
  0x52   :  { %v313_v20 = vsel %vm309_vm13, %v311_v17, %v307_v16  ;;  %v318_v21 = vsel %vm314_vm14, %v317_v18, %v312_v19 }
  0x53   :  { %v319_v22 = vsel %vm315_vm15, %v317_v18, %v313_v20  ;;  %320 = vst [vmem:[#allocation7] sm:$0xff] %v318_v21 }
  0x54   :  { %321 = vst [vmem:[#allocation7 + $0x8] sm:$0xff] %v319_v22 }
  0x55   :  { %431 = shalt.err (!%p428_p9)
}
  0x56   :  { %333 = dma.vmem_to_hbm [thread:$0]  %s328_s11, 256, %s718_s2, [#allocation6], %s448_s15, %s448_s15, %s449_s16  }
  0x57   :  { %444 = dma.done.wait [#allocation6], 256  }
  0x58   :  { %445 = vsyncadd [#allocation6], 4294967040 }
  0x59   :  { %337 = vsyncpa [#allocation5], 1 }
  0x5a   :  { %338 = vsyncpa [#allocation6], 1 }

</bundles_post_ra>
